<compile_context>
chip_gen: v7x
topology: tpu7x:2x2x1
jax: 0.10.0
libtpu: 0.0.40
codegen_flags: <defaults>
</compile_context>

<pallas_src>
import jax
import jax.numpy as jnp
from jax.experimental import pallas as pl
from jax.experimental.pallas import tpu as pltpu


def _mixprop_fused_kernel(t_ref, b_ref, x_ref, o_ref):
    """One grid step = one TM-wide slab of m = (b, t) columns.

    t_ref: [c_out*N, C*N]  fused operator (resident across the grid)
    b_ref: [c_out*N, 1]    f32 bias column (row o*N + n holds bias[o])
    x_ref: [C*N, TM]       features, rows = c*N + w, lanes = m = b*T + t
    o_ref: [c_out*N, TM]   output, rows = o*N + n, lanes = m
    """
    acc = jnp.dot(t_ref[...], x_ref[...], preferred_element_type=jnp.float32)
    o_ref[...] = jnp.maximum(acc + b_ref[...], 0.0).astype(o_ref.dtype)


def mixprop_gcn1(x, norm_adj, weight, bias, *, gdep, graph_shape=2,
                 mxu_dtype=jnp.float32, out_dtype=None, block_m=None):
    """x: [B, N, T, C] (torch 'bwtc'), norm_adj: [N, N],
    weight: [c_out, (gdep+1)*C] (torch nn.Linear convention), bias: [c_out].
    Returns [B, N, T, c_out].

    mxu_dtype=jnp.bfloat16 enables the bf16-input MXU fast path (f32 accumulation
    kept); out_dtype=jnp.bfloat16 additionally halves the output writeback."""
    if graph_shape != 2:
        # TODO(synk): batched adjacency ('bhw,bwtc->bhtc') path not implemented.
        raise NotImplementedError("only graph_shape == 2 is supported")

    B, N, T, C = x.shape
    c_out = weight.shape[0]
    assert weight.shape[1] == (gdep + 1) * C, (weight.shape, gdep, C)
    M = B * T
    out_dtype = x.dtype if out_dtype is None else jnp.dtype(out_dtype)
    hi = jax.lax.Precision.HIGHEST      # keep parameter prep in true f32

    # ---- host-side parameter prep: fold A^g powers + Linear weight into T ----
    # T[o*N + n, c*N + w] = sum_g W[o, g*C + c] * (A^g)[n, w]
    a32 = norm_adj.astype(jnp.float32)
    a_pows = [jnp.eye(N, dtype=jnp.float32)]
    for _ in range(gdep):
        a_pows.append(jnp.matmul(a32, a_pows[-1], precision=hi))
    a_pows = jnp.stack(a_pows)                                          # [gdep+1, N, N]
    w_g = weight.astype(jnp.float32).reshape(c_out, gdep + 1, C)        # W[o, g*C + c]
    t_op = jnp.einsum('ogc,gnw->oncw', w_g, a_pows, precision=hi)
    t_op = t_op.reshape(c_out * N, C * N)                               # [c_out*N, C*N]
    bias_col = jnp.broadcast_to(bias.astype(jnp.float32)[:, None],
                                (c_out, N)).reshape(c_out * N, 1)       # f32, added post-acc

    # ---- host-side layout plumbing (cheap XLA permutes / reshapes / padding) ----
    # features: [C*N, M], rows = c*N + w (w = input node), lanes = m = b*T + t
    xk = jnp.transpose(x, (3, 1, 0, 2)).reshape(C * N, M)

    # ---- choose the M block (TM): lane-dense, pipeline-friendly -------------
    if block_m is not None:
        assert block_m % 128 == 0, "block_m must be a multiple of 128 (lane width)"
        TM = block_m
        M_pad = ((M + TM - 1) // TM) * TM
    else:
        M_pad = max(((M + 127) // 128) * 128, 128)   # always lane-dense (no 16-lane blocks)
        TM = 128
        # Core-aware: only take a bigger block if >= 4 grid steps remain
        # (>= 2 steps per TensorCore on v7x => DMA/compute overlap on both cores).
        for tm in (512, 256):
            if M_pad % tm == 0 and M_pad // tm >= 4:
                TM = tm
                break

    if M_pad != M:
        xk = jnp.pad(xk, ((0, 0), (0, M_pad - M)))

    xk = xk.astype(mxu_dtype)        # bf16 halves feature-slab DMA on v5e/v6e/v7x
    t_op = t_op.astype(mxu_dtype)

    R, K = c_out * N, C * N
    grid = (M_pad // TM,)

    # ---- VMEM budget / cost hints -------------------------------------------
    in_item = jnp.dtype(mxu_dtype).itemsize
    out_item = jnp.dtype(out_dtype).itemsize
    x_blk = K * TM * in_item
    o_blk = R * TM * out_item
    t_bytes = R * K * in_item
    b_bytes = R * 4
    vmem_limit = int(min(64 * 2**20,
                         max(8 * 2**20,
                             2 * (x_blk + o_blk) + 2 * (t_bytes + b_bytes) + (2 << 20))))

    flops = 2 * R * K * M_pad
    bytes_accessed = (K * M_pad * in_item      # feature slab
                      + t_bytes + b_bytes      # resident operator + bias
                      + R * M_pad * out_item)  # output slab

    out_k = pl.pallas_call(
        _mixprop_fused_kernel,
        out_shape=jax.ShapeDtypeStruct((R, M_pad), out_dtype),
        grid=grid,
        in_specs=[
            # Fused operator: constant index map -> resident across the grid.
            # TODO(synk): for very large N, single-buffer it (pipeline_mode=pl.Buffered(1))
            #             or switch to the stacked-A^g two-matmul form.
            pl.BlockSpec((R, K), lambda i: (0, 0)),
            pl.BlockSpec((R, 1), lambda i: (0, 0)),     # bias column (resident, f32)
            pl.BlockSpec((K, TM), lambda i: (0, i)),    # feature slab block
        ],
        out_specs=pl.BlockSpec((R, TM), lambda i: (0, i)),
        compiler_params=pltpu.CompilerParams(
            dimension_semantics=("parallel",),
            vmem_limit_bytes=vmem_limit),
        cost_estimate=pl.CostEstimate(flops=flops, transcendentals=0,
                                      bytes_accessed=bytes_accessed),
    )(t_op, bias_col, xk)

    # [c_out*N, M_pad] -> [c_out, N, B, T] -> [B, N, T, c_out]
    out = out_k[:, :M].reshape(c_out, N, B, T)
    return jnp.transpose(out, (2, 1, 3, 0))


def _reference(x, norm_adj, weight, bias, gdep):
    """Plain-JAX replica of the PyTorch forward (highest precision) for verification."""
    hi = jax.lax.Precision.HIGHEST
    h = x
    outs = [h]
    for _ in range(gdep):
        h = jnp.einsum('hw,bwtc->bhtc', norm_adj, h, precision=hi)
        outs.append(h)
    ho = jnp.concatenate(outs, axis=-1)
    y = jnp.einsum('bntk,ok->bnto', ho, weight, precision=hi) + bias
    return jax.nn.relu(y)


def _make_case(key, B, N, T, C, gdep, c_out):
    kx, ka, kw, kb = jax.random.split(key, 4)
    x = jax.random.normal(kx, (B, N, T, C), dtype=jnp.float32)
    adj_raw = jax.random.uniform(ka, (N, N), dtype=jnp.float32) + 0.1
    norm_adj = adj_raw / jnp.sum(adj_raw, axis=-1, keepdims=True)
    k_in = (gdep + 1) * C
    bound = 1.0 / float(k_in) ** 0.5
    weight = jax.random.uniform(kw, (c_out, k_in), jnp.float32, -bound, bound)
    bias = jax.random.uniform(kb, (c_out,), jnp.float32, -bound, bound)
    return x, norm_adj, weight, bias


if __name__ == "__main__":
    gdep, c_out = 2, 8
    key = jax.random.PRNGKey(0)
    k1, k2 = jax.random.split(key)

    # Tolerances leave headroom for MXU pass-precision on f32 inputs; layout /
    # indexing bugs would produce O(1) errors and still be caught.
    RTOL_F32, ATOL_F32 = 1e-2, 1e-2
    RTOL_BF16, ATOL_BF16 = 5e-2, 5e-2

    # Case 1: module-spec small shapes (B=2, nodes=16, T=8, C=4).
    # M = 16 -> padded to a single lane-dense TM=128 block (no masked stores).
    x, A, W, b = _make_case(k1, 2, 16, 8, 4, gdep, c_out)
    out = jax.block_until_ready(mixprop_gcn1(x, A, W, b, gdep=gdep))
    ref = _reference(x, A, W, b, gdep)
    assert out.shape == ref.shape, (out.shape, ref.shape)
    assert jnp.allclose(out, ref, rtol=RTOL_F32, atol=ATOL_F32), \
        f"case1 max abs err = {jnp.max(jnp.abs(out - ref))}"

    # Case 2: multi-block path (M = 256 -> 2 grid steps of TM=128), f32 MXU inputs.
    x, A, W, b = _make_case(k2, 2, 16, 128, 4, gdep, c_out)
    out = jax.block_until_ready(mixprop_gcn1(x, A, W, b, gdep=gdep))
    ref = _reference(x, A, W, b, gdep)
    assert out.shape == ref.shape, (out.shape, ref.shape)
    assert jnp.allclose(out, ref, rtol=RTOL_F32, atol=ATOL_F32), \
        f"case2 max abs err = {jnp.max(jnp.abs(out - ref))}"

    # Case 2b: bf16 MXU-input fast path (f32 accumulation, f32 bias/ReLU),
    # recommended on all generations incl. v5e; loose tolerance.
    out_bf = jax.block_until_ready(
        mixprop_gcn1(x, A, W, b, gdep=gdep, mxu_dtype=jnp.bfloat16))
    assert out_bf.shape == ref.shape, (out_bf.shape, ref.shape)
    assert jnp.allclose(out_bf, ref, rtol=RTOL_BF16, atol=ATOL_BF16), \
        f"case2b max abs err = {jnp.max(jnp.abs(out_bf - ref))}"

    print("KERNEL_OK")
</pallas_src>

<mosaic_0001>
module attributes {stable_mosaic.version = 11 : i64} {
  func.func @_mixprop_fused_kernel(%arg0: i32, %arg1: memref<128x64xf32, #tpu.memory_space<vmem>>, %arg2: memref<128x1xf32, #tpu.memory_space<vmem>>, %arg3: memref<64x128xf32, #tpu.memory_space<vmem>>, %arg4: memref<128x128xf32, #tpu.memory_space<vmem>>) attributes {dimension_semantics = [#tpu.dimension_semantics<parallel>], iteration_bounds = array<i64: 1>, scalar_prefetch = 0 : i64, scratch_operands = 0 : i64, tpu.core_type = #tpu.core_type<tc>, window_params = [{pipeline_mode = #tpu.pipeline_mode<synchronous>, transform_indices = @transform_0, window_bounds = array<i64: 128, 64>}, {pipeline_mode = #tpu.pipeline_mode<synchronous>, transform_indices = @transform_1, window_bounds = array<i64: 128, 1>}, {transform_indices = @transform_2, window_bounds = array<i64: 64, 128>}, {transform_indices = @transform_3, window_bounds = array<i64: 128, 128>}]} {
    %c0 = arith.constant 0 : index
    %c0_0 = arith.constant 0 : index
    %0 = vector.load %arg1[%c0, %c0_0] : memref<128x64xf32, #tpu.memory_space<vmem>>, vector<128x64xf32>
    %c0_1 = arith.constant 0 : index
    %c0_2 = arith.constant 0 : index
    %1 = vector.load %arg3[%c0_1, %c0_2] : memref<64x128xf32, #tpu.memory_space<vmem>>, vector<64x128xf32>
    %cst = arith.constant dense<0.000000e+00> : vector<128x128xf32>
    %2 = tpu.matmul %0, %1, %cst {dimension_numbers = #tpu.dot_dimension_numbers<[1], [0], [0], [1], [0, 0, 1, 1], [], []>} : vector<128x64xf32>, vector<64x128xf32>, vector<128x128xf32> -> vector<128x128xf32>
    %c0_3 = arith.constant 0 : index
    %c0_4 = arith.constant 0 : index
    %3 = vector.load %arg2[%c0_3, %c0_4] : memref<128x1xf32, #tpu.memory_space<vmem>>, vector<128x1xf32>
    %4 = vector.broadcast %3 : vector<128x1xf32> to vector<128x128xf32>
    %5 = arith.addf %2, %4 : vector<128x128xf32>
    %cst_5 = arith.constant 0.000000e+00 : f32
    %6 = vector.broadcast %cst_5 : f32 to vector<128x128xf32>
    %7 = arith.maximumf %5, %6 : vector<128x128xf32>
    %c0_6 = arith.constant 0 : index
    %c0_7 = arith.constant 0 : index
    %8 = vector.load %arg4[%c0_6, %c0_7] : memref<128x128xf32, #tpu.memory_space<vmem>>, vector<128x128xf32>
    tpu.vector_store %arg4[%c0_6, %c0_7], %7 {strides = array<i32>} : memref<128x128xf32, #tpu.memory_space<vmem>>, vector<128x128xf32>,
    return
  }
  func.func @transform_0(%arg0: i32) -> (i32, i32) {
    %c0_i32 = arith.constant 0 : i32
    %c0_i32_0 = arith.constant 0 : i32
    %c0_i32_1 = arith.constant 0 : i32
    return %c0_i32, %c0_i32_0 : i32, i32
  }
  func.func @transform_1(%arg0: i32) -> (i32, i32) {
    %c0_i32 = arith.constant 0 : i32
    %c0_i32_0 = arith.constant 0 : i32
    %c0_i32_1 = arith.constant 0 : i32
    return %c0_i32, %c0_i32_0 : i32, i32
  }
  func.func @transform_2(%arg0: i32) -> (i32, i32) {
    %c0_i32 = arith.constant 0 : i32
    %c0_i32_0 = arith.constant 0 : i32
    return %c0_i32, %arg0 : i32, i32
  }
  func.func @transform_3(%arg0: i32) -> (i32, i32) {
    %c0_i32 = arith.constant 0 : i32
    %c0_i32_0 = arith.constant 0 : i32
    return %c0_i32, %arg0 : i32, i32
  }
}

</mosaic_0001>

<bundles_post_ra>
// kernel: tpu_custom_call.1
= control target key start
LH: loop header
LB: loop body
LE: loop exit
PB: predicated region body
PF: predicated region fallthrough
CT: control target
= control target key end

     0   :  { %v511_v5 = vmov 0   ;;  %vm135_vm0 = vcmask 523264   ;;  %s686_s0 = inlined_call_operand.vmem [shape: f32[128,64], index: 0, kind: input, shape index: {}]   ;;  %s687_s1 = inlined_call_operand.vmem [shape: f32[128,1], index: 1, kind: input, shape index: {}]   ;;  %s688_s2 = inlined_call_operand.vmem [shape: f32[64,128], index: 2, kind: input, shape index: {}]   ;;  %s689_s3 = inlined_call_operand.hbm [shape: f32[128,128], index: 3, kind: output, shape index: {}]  }
   0x1   :  { %v31_v0 = vld [vmem:[%s688_s2] sm:$0xff]  ;;  %v32_v1 = vld [vmem:[%s688_s2 + $0x8] sm:$0xff]  ;;  %v33_v2 = vld [vmem:[%s688_s2 + $0x10] sm:$0xff]  ;;  %486 = vset.pattern.permute.xlu1 %v511_v5  ;;  %485 = vset.pattern.permute.xlu0 %v511_v5 }
   0x2   :  { %v457_v3 = vpack.c.bf16 %v32_v1, %v31_v0  ;;  %v34_v4 = vld [vmem:[%s688_s2 + $0x18] sm:$0xff]  ;;  %v35_v7 = vld [vmem:[%s688_s2 + $0x20] sm:$0xff]  ;;  %v36_v8 = vld [vmem:[%s688_s2 + $0x28] sm:$0xff] }
   0x3   :  { %v461_v6 = vpack.c.bf16 %v34_v4, %v33_v2  ;;  %v15_v9 = vld [vmem:[%s686_s0] sm:$0xff]  ;;  %v465_v11 = vpack.c.bf16 %v36_v8, %v35_v7  ;;  %v37_v12 = vld [vmem:[%s688_s2 + $0x30] sm:$0xff]  ;;  %v38_v13 = vld [vmem:[%s688_s2 + $0x38] sm:$0xff] }
   0x4   :  { %458 = vmatprep.subr.bf16.mxu0 %v457_v3  ;;  %473 = vmatprep.subr.bf16.mxu1 %v457_v3  ;;  %v23_v10 = vld [vmem:[%s686_s0 + $0x40] sm:$0xff]  ;;  %v41_v14 = vld [vmem:[%s687_s1 + $0x10] sm:$0xff]  ;;  %v469_v16 = vpack.c.bf16 %v38_v13, %v37_v12  ;;  %v42_v17 = vld [vmem:[%s687_s1 + $0x18] sm:$0xff] }
   0x5   :  { %460 = vmatpush3.bf16.msra.mxu0 %v457_v3  ;;  %477 = vmatpush3.bf16.msra.mxu1 %v457_v3  ;;  %v39_v15 = vld [vmem:[%s687_s1] sm:$0xff]  ;;  %v40_v18 = vld [vmem:[%s687_s1 + $0x8] sm:$0xff] }
   0x6   :  { %462 = vmatprep.subr.bf16.mxu0 %v461_v6  ;;  %474 = vmatprep.subr.bf16.mxu1 %v461_v6 }
   0x7   :  { %433 = vmatprep.mubr.msk.f32.mxu0 %vm135_vm0, %v15_v9  ;;  %445 = vmatprep.mubr.msk.f32.mxu1 %vm135_vm0, %v23_v10 }
   0x8   :  { %67 = vperm.xlu1 %486, %v41_v14   ;;  %57 = vperm.xlu0 %485, %v39_v15  }
   0x9   :  { %464 = vmatpush3.bf16.msra.mxu0 %v461_v6  ;;  %478 = vmatpush3.bf16.msra.mxu1 %v461_v6 }
   0xa   :  { %466 = vmatprep.subr.bf16.mxu0 %v465_v11  ;;  %475 = vmatprep.subr.bf16.mxu1 %v465_v11 }
   0xd   :  { %468 = vmatpush3.bf16.msra.mxu0 %v465_v11  ;;  %479 = vmatpush3.bf16.msra.mxu1 %v465_v11 }
   0xe   :  { %470 = vmatprep.subr.bf16.mxu0 %v469_v16  ;;  %476 = vmatprep.subr.bf16.mxu1 %v469_v16 }
   0xf   :  { %8 = vsyncpa [#allocation3], 0  ;;  %72 = vperm.xlu1 %486, %v42_v17   ;;  %62 = vperm.xlu0 %485, %v40_v18   ;;  %v44_v19 = vld [vmem:[%s687_s1 + $0x28] sm:$0xff]  ;;  %v43_v20 = vld [vmem:[%s687_s1 + $0x20] sm:$0xff] }
  0x10   :  { %v16_v21 = vld [vmem:[%s686_s0 + $0x8] sm:$0xff]  ;;  %v17_v23 = vld [vmem:[%s686_s0 + $0x10] sm:$0xff]  ;;  %v46_v25 = vld [vmem:[%s687_s1 + $0x38] sm:$0xff] }
  0x11   :  { %472 = vmatpush3.bf16.msra.mxu0 %v469_v16  ;;  %480 = vmatpush3.bf16.msra.mxu1 %v469_v16  ;;  %v24_v22 = vld [vmem:[%s686_s0 + $0x48] sm:$0xff]  ;;  %v25_v24 = vld [vmem:[%s686_s0 + $0x50] sm:$0xff]  ;;  %v18_v27 = vld [vmem:[%s686_s0 + $0x18] sm:$0xff] }
  0x12   :  { %v45_v26 = vld [vmem:[%s687_s1 + $0x30] sm:$0xff]  ;;  %v26_v28 = vld [vmem:[%s686_s0 + $0x58] sm:$0xff]  ;;  %v19_v29 = vld [vmem:[%s686_s0 + $0x20] sm:$0xff] }
  0x13   :  { %82 = vperm.xlu1 %486, %v44_v19   ;;  %77 = vperm.xlu0 %485, %v43_v20   ;;  %v27_v30 = vld [vmem:[%s686_s0 + $0x60] sm:$0xff]  ;;  %v48_v31 = vld [vmem:[%s687_s1 + $0x48] sm:$0xff]  ;;  %v21_v35 = vld [vmem:[%s686_s0 + $0x30] sm:$0xff] }
  0x14   :  { %434 = vmatmul.mubr.msk.f32.vlgmr.msra.gmra.mrb[0].mxu0 %vm135_vm0, %v16_v21  ;;  %446 = vmatmul.mubr.msk.f32.vlgmr.msra.gmra.mrb[0].mxu1 %vm135_vm0, %v24_v22  ;;  %v47_v32 = vld [vmem:[%s687_s1 + $0x40] sm:$0xff]  ;;  %v20_v33 = vld [vmem:[%s686_s0 + $0x28] sm:$0xff]  ;;  %v29_v36 = vld [vmem:[%s686_s0 + $0x70] sm:$0xff] }
  0x15   :  { %436 = vmatprep.mubr.msk.f32.mxu0 %vm135_vm0, %v17_v23  ;;  %448 = vmatprep.mubr.msk.f32.mxu1 %vm135_vm0, %v25_v24  ;;  %v28_v34 = vld [vmem:[%s686_s0 + $0x68] sm:$0xff]  ;;  %v50_v37 = vld [vmem:[%s687_s1 + $0x58] sm:$0xff]  ;;  %v49_v38 = vld [vmem:[%s687_s1 + $0x50] sm:$0xff] }
  0x16   :  { %v22_v39 = vld [vmem:[%s686_s0 + $0x38] sm:$0xff]  ;;  %v52_v41 = vld [vmem:[%s687_s1 + $0x68] sm:$0xff]  ;;  %v51_v42 = vld [vmem:[%s687_s1 + $0x60] sm:$0xff] }
  0x17   :  { %92 = vperm.xlu1 %486, %v46_v25   ;;  %87 = vperm.xlu0 %485, %v45_v26   ;;  %v30_v40 = vld [vmem:[%s686_s0 + $0x78] sm:$0xff]  ;;  %v53_v44 = vld [vmem:[%s687_s1 + $0x70] sm:$0xff] }
  0x18   :  { %437 = vmatmul.mubr.msk.f32.gmra.mrb[2].mxu0 %vm135_vm0, %v18_v27  ;;  %449 = vmatmul.mubr.msk.f32.gmra.mrb[2].mxu1 %vm135_vm0, %v26_v28  ;;  %v54_v43 = vld [vmem:[%s687_s1 + $0x78] sm:$0xff]  ;;  %s512_s1 = smov [#allocation2]  }
  0x19   :  { %439 = vmatprep.mubr.msk.f32.mxu0 %vm135_vm0, %v19_v29  ;;  %451 = vmatprep.mubr.msk.f32.mxu1 %vm135_vm0, %v27_v30  ;;  %s366_s8 = sshll.u32 %s512_s1, 4  ;;  %s367_s8 = int_to_ptr.vmem [resolvable:$true] %s366_s8 }
  0x1a   :  { %s487_s2 = scalar_lea.vmem %s367_s8, 2048  ;;  %p492_p1 = scmp.lt.s32.totalorder %s367_s8, %s367_s8 }
  0x1b   :  { %102 = vperm.xlu1 %486, %v48_v31   ;;  %97 = vperm.xlu0 %485, %v47_v32   ;;  %p488_p0 = scmp.ne.s32.totalorder %s367_s8, %s487_s2  ;;  %p493_p2 = scmp.lt.s32.totalorder %s487_s2, %s487_s2 }
  0x1c   :  { %440 = vmatmul.mubr.msk.f32.gmra.mrb[4].mxu0 %vm135_vm0, %v20_v33  ;;  %452 = vmatmul.mubr.msk.f32.gmra.mrb[4].mxu1 %vm135_vm0, %v28_v34 }
  0x1d   :  { %442 = vmatprep.mubr.msk.f32.mxu0 %vm135_vm0, %v21_v35  ;;  %454 = vmatprep.mubr.msk.f32.mxu1 %vm135_vm0, %v29_v36  ;;  %p494_p3 = por %p493_p2, %p492_p1 }
  0x1f   :  { %112 = vperm.xlu1 %486, %v50_v37   ;;  %107 = vperm.xlu0 %485, %v49_v38   ;;  %p495_p4 = pnand %p494_p3, %p488_p0 }
  0x20   :  { %443 = vmatmul.mubr.msk.f32.gmra.mrb[6].mxu0 %vm135_vm0, %v22_v39  ;;  %455 = vmatmul.mubr.msk.f32.gmra.mrb[6].mxu1 %vm135_vm0, %v30_v40 }
  0x23   :  { %122 = vperm.xlu1 %486, %v52_v41   ;;  %117 = vperm.xlu0 %485, %v51_v42  }
  0x27   :  { %132 = vperm.xlu1 %486, %v54_v43   ;;  %127 = vperm.xlu0 %485, %v53_v44  }
  0x87   :  { %v68_v45 = vpop.permute.xlu1 %67  ;;  %v58_v46 = vpop.permute.xlu0 %57 }
  0x8e   :  { %v73_v47 = vpop.permute.xlu1 %72  ;;  %v63_v48 = vpop.permute.xlu0 %62 }
  0x92   :  { %v83_v49 = vpop.permute.xlu1 %82  ;;  %v78_v50 = vpop.permute.xlu0 %77 }
  0x96   :  { %v93_v51 = vpop.permute.xlu1 %92  ;;  %v671_v52 = vpop.permute.xlu0 %87 }
  0x9a   :  { %v103_v53 = vpop.permute.xlu1 %102  ;;  %v98_v54 = vpop.permute.xlu0 %97 }
  0x9e   :  { %v113_v55 = vpop.permute.xlu1 %112  ;;  %v108_v56 = vpop.permute.xlu0 %107 }
  0xa2   :  { %v123_v1 = vpop.permute.xlu1 %122  ;;  %v118_v2 = vpop.permute.xlu0 %117 }
  0xa6   :  { %v133_v27 = vpop.permute.xlu1 %132  ;;  %v128_v28 = vpop.permute.xlu0 %127 }
  0xe7   :  { %v435_v57 = vpop.f32.mrb[0].mxu0  ;;  %v447_v58 = vpop.f32.mrb[0].mxu1 }
  0xe8   :  { %v256_v59 = vadd.f32 %v435_v57, %v63_v48  ;;  %v296_v60 = vadd.f32 %v447_v58, %v103_v53  ;;  %v250_v61 = vpop.f32.mrb[1].mxu0  ;;  %v290_v62 = vpop.f32.mrb[1].mxu1 }
  0xe9   :  { %v251_v63 = vadd.f32 %v250_v61, %v58_v46  ;;  %v291_v0 = vadd.f32 %v290_v62, %v98_v54 }
  0xea   :  { %v330_v3 = vmax.f32 %v256_v59, 0.0  ;;  %v338_v4 = vmax.f32 %v296_v60, 0.0 }
  0xeb   :  { %v329_v5 = vmax.f32 %v251_v63, 0.0  ;;  %v337_v6 = vmax.f32 %v291_v0, 0.0  ;;  %v438_v7 = vpop.f32.mrb[2].mxu0  ;;  %v450_v8 = vpop.f32.mrb[2].mxu1 }
  0xec   :  { %346 = vst [vmem:[#allocation2 + $0x8] sm:$0xff] %v330_v3  ;;  %354 = vst [vmem:[#allocation2 + $0x48] sm:$0xff] %v338_v4  ;;  %v266_v9 = vadd.f32 %v438_v7, %v73_v47  ;;  %v306_v10 = vadd.f32 %v450_v8, %v113_v55  ;;  %v260_v11 = vpop.f32.mrb[3].mxu0  ;;  %v300_v12 = vpop.f32.mrb[3].mxu1 }
  0xed   :  { %345 = vst [vmem:[#allocation2] sm:$0xff] %v329_v5  ;;  %353 = vst [vmem:[#allocation2 + $0x40] sm:$0xff] %v337_v6  ;;  %v261_v13 = vadd.f32 %v260_v11, %v68_v45  ;;  %v301_v14 = vadd.f32 %v300_v12, %v108_v56 }
  0xee   :  { %v332_v15 = vmax.f32 %v266_v9, 0.0  ;;  %v340_v16 = vmax.f32 %v306_v10, 0.0 }
  0xef   :  { %v331_v17 = vmax.f32 %v261_v13, 0.0  ;;  %v339_v18 = vmax.f32 %v301_v14, 0.0  ;;  %v441_v19 = vpop.f32.mrb[4].mxu0  ;;  %v453_v20 = vpop.f32.mrb[4].mxu1 }
  0xf0   :  { %348 = vst [vmem:[#allocation2 + $0x18] sm:$0xff] %v332_v15  ;;  %356 = vst [vmem:[#allocation2 + $0x58] sm:$0xff] %v340_v16  ;;  %v276_v21 = vadd.f32 %v441_v19, %v83_v49  ;;  %v316_v22 = vadd.f32 %v453_v20, %v123_v1  ;;  %v270_v23 = vpop.f32.mrb[5].mxu0  ;;  %v310_v24 = vpop.f32.mrb[5].mxu1 }
  0xf1   :  { %347 = vst [vmem:[#allocation2 + $0x10] sm:$0xff] %v331_v17  ;;  %355 = vst [vmem:[#allocation2 + $0x50] sm:$0xff] %v339_v18  ;;  %v271_v25 = vadd.f32 %v270_v23, %v78_v50  ;;  %v311_v26 = vadd.f32 %v310_v24, %v118_v2 }
  0xf2   :  { %v334_v29 = vmax.f32 %v276_v21, 0.0  ;;  %v342_v30 = vmax.f32 %v316_v22, 0.0 }
  0xf3   :  { %v333_v31 = vmax.f32 %v271_v25, 0.0  ;;  %v341_v32 = vmax.f32 %v311_v26, 0.0  ;;  %v444_v33 = vpop.f32.mrb[6].mxu0  ;;  %v456_v34 = vpop.f32.mrb[6].mxu1 }
  0xf4   :  { %350 = vst [vmem:[#allocation2 + $0x28] sm:$0xff] %v334_v29  ;;  %358 = vst [vmem:[#allocation2 + $0x68] sm:$0xff] %v342_v30  ;;  %v286_v35 = vadd.f32 %v444_v33, %v93_v51  ;;  %v326_v36 = vadd.f32 %v456_v34, %v133_v27  ;;  %v280_v37 = vpop.f32.mrb[7].mxu0  ;;  %v320_v38 = vpop.f32.mrb[7].mxu1 }
  0xf5   :  { %349 = vst [vmem:[#allocation2 + $0x20] sm:$0xff] %v333_v31  ;;  %357 = vst [vmem:[#allocation2 + $0x60] sm:$0xff] %v341_v32  ;;  %v281_v39 = vadd.f32 %v280_v37, %v671_v52  ;;  %v321_v40 = vadd.f32 %v320_v38, %v128_v28 }
  0xf6   :  { %v336_v41 = vmax.f32 %v286_v35, 0.0  ;;  %v344_v42 = vmax.f32 %v326_v36, 0.0 }
  0xf7   :  { %v335_v43 = vmax.f32 %v281_v39, 0.0  ;;  %v343_v44 = vmax.f32 %v321_v40, 0.0 }
  0xf8   :  { %352 = vst [vmem:[#allocation2 + $0x38] sm:$0xff] %v336_v41  ;;  %360 = vst [vmem:[#allocation2 + $0x78] sm:$0xff] %v344_v42 }
  0xf9   :  { %351 = vst [vmem:[#allocation2 + $0x30] sm:$0xff] %v335_v43  ;;  %359 = vst [vmem:[#allocation2 + $0x70] sm:$0xff] %v343_v44 }
  0xfa   :  { %498 = shalt.err (!%p495_p4)
}
  0xfb   :  { %s499_s11 = scalar_lea.hbm %s689_s3, 2048 }
  0xfc   :  { %p500_p5 = scmp.ne.s32.totalorder %s689_s3, %s499_s11  ;;  %p503_p6 = scmp.lt.u32.totalorder %s499_s11, %s689_s3 }
  0xfe   :  { %p505_p7 = pnand %p503_p6, %p500_p5 }
 0x100   :  { %508 = shalt.err (!%p505_p7)
}
 0x101   :  { %s513_s16 = smov 128   ;;  %s514_s17 = smov 8  }
 0x102   :  { %372 = dma.vmem_to_hbm [thread:$0]  %s367_s8, 2048, %s689_s3, [#allocation3], %s513_s16, %s513_s16, %s514_s17  }
 0x103   :  { %509 = dma.done.wait [#allocation3], 2048  }
 0x104   :  { %510 = vsyncadd [#allocation3], 4294965248 }
 0x105   :  { %376 = vsyncpa [#allocation3], 1 }

</bundles_post_ra>
